<compile_context>
chip_gen: v7x
topology: tpu7x:2x2x1
jax: 0.10.0
libtpu: 0.0.40
codegen_flags: <defaults>
</compile_context>

<pallas_src>
import functools

import jax
import jax.numpy as jnp
from jax import lax
from jax.experimental import pallas as pl
from jax.experimental.pallas import tpu as pltpu


def _layernorm(v, g, b, eps=1e-5):
    mu = jnp.mean(v, axis=-1, keepdims=True)
    var = jnp.mean((v - mu) ** 2, axis=-1, keepdims=True)
    return (v - mu) * lax.rsqrt(var + eps) * g + b


def block_kernel(
    x_ref,        # (1, T, C)  f32   full sequence (residual + LN1, K/V + Q side)
    wq_ref,       # (C, C)     bf16  fused per-head query weights
    wkv_ref,      # (C, 2C)    bf16  fused [Wk | Wv]
    wproj_ref,    # (C, C)     bf16  output projection (x @ W layout)
    bproj_ref,    # (1, C)     f32
    g1_ref, b1_ref,   # (1, C) f32   LayerNorm 1
    g2_ref, b2_ref,   # (1, C) f32   LayerNorm 2
    w1_ref,       # (C, 4C)    bf16
    bf1_ref,      # (1, 4C)    f32
    w2_ref,       # (4C, C)    bf16
    bf2_ref,      # (1, C)     f32
    out_ref,      # (1, tq, C)
    *, n_head, tq,
):
    bf16 = jnp.bfloat16
    f32 = jnp.float32

    qi = pl.program_id(1)
    q_start = pl.multiple_of(qi * tq, tq)

    x_full = x_ref[0]                            # (T, C) f32
    x_tile = x_ref[0, pl.ds(q_start, tq), :]     # (tq, C) f32 (same VMEM block)
    T, C = x_full.shape
    H = n_head
    hs = C // H
    scale = C ** (-0.5)        # NOTE: reference scales by n_embed, not head_size

    # ---- LN1 (f32, VPU) ----
    g1 = g1_ref[...]
    b1 = b1_ref[...]
    h1_full = _layernorm(x_full, g1, b1)         # (T, C)  -> K/V side
    h1_tile = _layernorm(x_tile, g1, b1)         # (tq, C) -> Q side

    # ---- fused projections on the MXU (bf16 in, f32 accumulate) ----
    # Fold the softmax scale into Q once instead of scaling every (tq, T) score map.
    q = jnp.dot(h1_tile.astype(bf16), wq_ref[...],
                preferred_element_type=f32) * scale                    # (tq, C)
    kv = jnp.dot(h1_full.astype(bf16), wkv_ref[...],
                 preferred_element_type=f32)                           # (T, 2C)
    k = kv[:, :C]
    v = kv[:, C:]

    # causal additive mask for this query tile (global row = q_start + local row)
    row = lax.broadcasted_iota(jnp.int32, (tq, T), 0) + q_start
    col = lax.broadcasted_iota(jnp.int32, (tq, T), 1)
    mask_bias = jnp.where(row >= col, 0.0, -1e30).astype(f32)          # (tq, T)

    # ---- per-head attention; output projection folded into the loop ----
    wproj = wproj_ref[...]                                             # (C, C) bf16
    sa = jnp.zeros((tq, C), f32)
    for h in range(H):
        lo = h * hs
        qh = q[:, lo:lo + hs].astype(bf16)       # (tq, hs)
        kh = k[:, lo:lo + hs].astype(bf16)       # (T,  hs)
        vh = v[:, lo:lo + hs].astype(bf16)       # (T,  hs)

        s = jnp.dot(qh, kh.T, preferred_element_type=f32) + mask_bias  # (tq, T)
        s = s - jnp.max(s, axis=-1, keepdims=True)
        e = jnp.exp(s)
        p = e * pl.reciprocal(jnp.sum(e, axis=-1, keepdims=True), approx=True)

        o_h = jnp.dot(p.astype(bf16), vh, preferred_element_type=f32)  # (tq, hs)
        # accumulate this head's projection contribution (no lane-dim concat)
        sa = sa + jnp.dot(o_h.astype(bf16), wproj[lo:lo + hs, :],
                          preferred_element_type=f32)

    x1 = x_tile + sa + bproj_ref[...]

    # ---- LN2 + feed-forward ----
    h2 = _layernorm(x1, g2_ref[...], b2_ref[...])
    ff = jnp.dot(h2.astype(bf16), w1_ref[...],
                 preferred_element_type=f32) + bf1_ref[...]
    ff = jnp.maximum(ff, 0.0)
    ff = jnp.dot(ff.astype(bf16), w2_ref[...],
                 preferred_element_type=f32) + bf2_ref[...]

    out_ref[0] = (x1 + ff).astype(out_ref.dtype)


def transformer_block(x, params, n_head, tq=None):
    """x: (B, T, C) float32. params: dict of f32 weights (see init_params)."""
    B, T, C = x.shape
    assert C % n_head == 0
    assert T % 8 == 0, "sequence length must respect 8-sublane tiling"
    if tq is None:
        tq = min(128, T)
    assert T % tq == 0
    C4 = params["w1"].shape[1]

    # fuse + cast big matmul weights to bf16; keep biases / LN params in f32
    wq = params["wq"].astype(jnp.bfloat16)
    wkv = jnp.concatenate([params["wk"], params["wv"]], axis=1).astype(jnp.bfloat16)
    wproj = params["wproj"].astype(jnp.bfloat16)
    w1 = params["w1"].astype(jnp.bfloat16)
    w2 = params["w2"].astype(jnp.bfloat16)

    def rep(shape):
        # whole-array block, grid-invariant (pipeliner fetches it once)
        return pl.BlockSpec(shape, lambda b, q: tuple(0 for _ in shape))

    in_specs = [
        pl.BlockSpec((1, T, C), lambda b, q: (b, 0, 0)),    # x full sequence
        rep((C, C)),                                        # wq (fused heads)
        rep((C, 2 * C)),                                    # wkv
        rep((C, C)),                                        # wproj
        rep((1, C)),                                        # bproj
        rep((1, C)), rep((1, C)),                           # ln1 gamma, beta
        rep((1, C)), rep((1, C)),                           # ln2 gamma, beta
        rep((C, C4)),                                       # w1
        rep((1, C4)),                                       # bf1
        rep((C4, C)),                                       # w2
        rep((1, C)),                                        # bf2
    ]

    kernel = functools.partial(block_kernel, n_head=n_head, tq=tq)

    # TODO(synk): for very long T, LN1 + the K/V projection are recomputed per
    # query tile; a flash-style kv-tiled inner loop would remove that redundancy.
    return pl.pallas_call(
        kernel,
        out_shape=jax.ShapeDtypeStruct((B, T, C), x.dtype),
        grid=(B, T // tq),
        in_specs=in_specs,
        out_specs=pl.BlockSpec((1, tq, C), lambda b, q: (b, q, 0)),
        compiler_params=pltpu.CompilerParams(
            dimension_semantics=("parallel", "parallel"),
            vmem_limit_bytes=48 * 1024 * 1024,
        ),
    )(
        x,
        wq, wkv, wproj, params["bproj"],
        params["g1"], params["b1"], params["g2"], params["b2"],
        w1, params["bf1"], w2, params["bf2"],
    )


def init_params(key, n_embed, n_head):
    """Deterministic synthetic parameters.

    wq / wk / wv are stored head-fused: columns [h*hs:(h+1)*hs] hold head h's
    (n_embed, head_size) projection (x @ W layout, i.e. PyTorch's nn.Linear
    weight transposed)."""
    keys = jax.random.split(key, 10)

    def rnd(k, shape, scale=0.05):
        return jax.random.normal(k, shape, dtype=jnp.float32) * scale

    wq = rnd(keys[0], (n_embed, n_embed))
    wk = rnd(keys[1], (n_embed, n_embed))
    wv = rnd(keys[2], (n_embed, n_embed))

    wproj = rnd(keys[3], (n_embed, n_embed))
    bproj = rnd(keys[4], (1, n_embed))

    g1 = jnp.ones((1, n_embed), jnp.float32)
    b1 = jnp.zeros((1, n_embed), jnp.float32)
    g2 = jnp.ones((1, n_embed), jnp.float32)
    b2 = jnp.zeros((1, n_embed), jnp.float32)

    w1 = rnd(keys[5], (n_embed, 4 * n_embed))
    bf1 = rnd(keys[6], (1, 4 * n_embed))
    w2 = rnd(keys[7], (4 * n_embed, n_embed))
    bf2 = rnd(keys[8], (1, n_embed))

    return dict(wq=wq, wk=wk, wv=wv, wproj=wproj, bproj=bproj,
                g1=g1, b1=b1, g2=g2, b2=b2,
                w1=w1, bf1=bf1, w2=w2, bf2=bf2)


def reference_block(x, p, n_head):
    """Pure-JAX f32 reference mirroring the PyTorch module semantics."""
    def ln(v, g, b):
        mu = jnp.mean(v, axis=-1, keepdims=True)
        var = jnp.mean((v - mu) ** 2, axis=-1, keepdims=True)
        return (v - mu) / jnp.sqrt(var + 1e-5) * g + b

    B, T, C = x.shape
    hs = C // n_head
    h1 = ln(x, p["g1"], p["b1"])
    tril = jnp.tril(jnp.ones((T, T), jnp.float32))
    heads = []
    for h in range(n_head):
        sl = slice(h * hs, (h + 1) * hs)
        q = h1 @ p["wq"][:, sl]
        k = h1 @ p["wk"][:, sl]
        v = h1 @ p["wv"][:, sl]
        wei = (q @ jnp.swapaxes(k, -2, -1)) * (C ** -0.5)
        wei = jnp.where(tril == 0, -jnp.inf, wei)
        wei = jax.nn.softmax(wei, axis=-1)
        heads.append(wei @ v)
    sa = jnp.concatenate(heads, axis=-1) @ p["wproj"] + p["bproj"]
    x1 = x + sa
    h2 = ln(x1, p["g2"], p["b2"])
    ff = jnp.maximum(h2 @ p["w1"] + p["bf1"], 0.0) @ p["w2"] + p["bf2"]
    return x1 + ff


if __name__ == "__main__":
    B, T, n_embed, n_head = 2, 8, 32, 4   # block_size == T (small demo shapes)

    key = jax.random.PRNGKey(0)
    kx, kp = jax.random.split(key)
    x = jax.random.normal(kx, (B, T, n_embed), dtype=jnp.float32)
    params = init_params(kp, n_embed, n_head)

    out = transformer_block(x, params, n_head)
    out = jax.block_until_ready(out)

    ref = reference_block(x, params, n_head)
    assert out.shape == (B, T, n_embed)
    assert jnp.allclose(out, ref, atol=2e-2, rtol=2e-2), "mismatch vs reference"

    print("KERNEL_OK")
</pallas_src>

<mosaic_0001>
module attributes {stable_mosaic.version = 11 : i64} {
  func.func @block_kernel(%arg0: i32, %arg1: i32, %arg2: memref<1x8x32xf32, #tpu.memory_space<vmem>>, %arg3: memref<32x32xbf16, #tpu.memory_space<vmem>>, %arg4: memref<32x64xbf16, #tpu.memory_space<vmem>>, %arg5: memref<32x32xbf16, #tpu.memory_space<vmem>>, %arg6: memref<1x32xf32, #tpu.memory_space<vmem>>, %arg7: memref<1x32xf32, #tpu.memory_space<vmem>>, %arg8: memref<1x32xf32, #tpu.memory_space<vmem>>, %arg9: memref<1x32xf32, #tpu.memory_space<vmem>>, %arg10: memref<1x32xf32, #tpu.memory_space<vmem>>, %arg11: memref<32x128xbf16, #tpu.memory_space<vmem>>, %arg12: memref<1x128xf32, #tpu.memory_space<vmem>>, %arg13: memref<128x32xbf16, #tpu.memory_space<vmem>>, %arg14: memref<1x32xf32, #tpu.memory_space<vmem>>, %arg15: memref<1x8x32xf32, #tpu.memory_space<vmem>>) attributes {dimension_semantics = [#tpu.dimension_semantics<parallel>, #tpu.dimension_semantics<parallel>], iteration_bounds = array<i64: 2, 1>, scalar_prefetch = 0 : i64, scratch_operands = 0 : i64, tpu.core_type = #tpu.core_type<tc>, window_params = [{transform_indices = @transform_0, window_bounds = array<i64: 1, 8, 32>}, {pipeline_mode = #tpu.pipeline_mode<synchronous>, transform_indices = @transform_1, window_bounds = array<i64: 32, 32>}, {pipeline_mode = #tpu.pipeline_mode<synchronous>, transform_indices = @transform_2, window_bounds = array<i64: 32, 64>}, {pipeline_mode = #tpu.pipeline_mode<synchronous>, transform_indices = @transform_3, window_bounds = array<i64: 32, 32>}, {pipeline_mode = #tpu.pipeline_mode<synchronous>, transform_indices = @transform_4, window_bounds = array<i64: 1, 32>}, {pipeline_mode = #tpu.pipeline_mode<synchronous>, transform_indices = @transform_5, window_bounds = array<i64: 1, 32>}, {pipeline_mode = #tpu.pipeline_mode<synchronous>, transform_indices = @transform_6, window_bounds = array<i64: 1, 32>}, {pipeline_mode = #tpu.pipeline_mode<synchronous>, transform_indices = @transform_7, window_bounds = array<i64: 1, 32>}, {pipeline_mode = #tpu.pipeline_mode<synchronous>, transform_indices = @transform_8, window_bounds = array<i64: 1, 32>}, {pipeline_mode = #tpu.pipeline_mode<synchronous>, transform_indices = @transform_9, window_bounds = array<i64: 32, 128>}, {pipeline_mode = #tpu.pipeline_mode<synchronous>, transform_indices = @transform_10, window_bounds = array<i64: 1, 128>}, {pipeline_mode = #tpu.pipeline_mode<synchronous>, transform_indices = @transform_11, window_bounds = array<i64: 128, 32>}, {pipeline_mode = #tpu.pipeline_mode<synchronous>, transform_indices = @transform_12, window_bounds = array<i64: 1, 32>}, {transform_indices = @transform_13, window_bounds = array<i64: 1, 8, 32>}]} {
    %c8_i32 = arith.constant 8 : i32
    %0 = arith.muli %arg1, %c8_i32 : i32
    %1 = tpu.assume_multiple %0, 8 : i32
    %c0 = arith.constant 0 : index
    %c0_0 = arith.constant 0 : index
    %c0_1 = arith.constant 0 : index
    %2 = vector.load %arg2[%c0, %c0_0, %c0_1] : memref<1x8x32xf32, #tpu.memory_space<vmem>>, vector<1x8x32xf32>
    %3 = vector.shape_cast %2 : vector<1x8x32xf32> to vector<8x32xf32>
    %c0_2 = arith.constant 0 : index
    %4 = arith.index_cast %1 : i32 to index
    %c0_3 = arith.constant 0 : index
    %5 = vector.load %arg2[%c0_2, %4, %c0_3] : memref<1x8x32xf32, #tpu.memory_space<vmem>>, vector<1x8x32xf32>
    %6 = vector.shape_cast %5 : vector<1x8x32xf32> to vector<8x32xf32>
    %c0_4 = arith.constant 0 : index
    %c0_5 = arith.constant 0 : index
    %7 = vector.load %arg7[%c0_4, %c0_5] : memref<1x32xf32, #tpu.memory_space<vmem>>, vector<1x32xf32>
    %c0_6 = arith.constant 0 : index
    %c0_7 = arith.constant 0 : index
    %8 = vector.load %arg8[%c0_6, %c0_7] : memref<1x32xf32, #tpu.memory_space<vmem>>, vector<1x32xf32>
    %cst = arith.constant dense<0.000000e+00> : vector<8xf32>
    %9 = vector.multi_reduction <add>, %3, %cst [1] : vector<8x32xf32> to vector<8xf32>
    %10 = vector.shape_cast %9 : vector<8xf32> to vector<8x1xf32>
    %cst_8 = arith.constant 3.200000e+01 : f32
    %11 = vector.broadcast %cst_8 : f32 to vector<8x1xf32>
    %12 = arith.divf %10, %11 : vector<8x1xf32>
    %13 = vector.broadcast %12 : vector<8x1xf32> to vector<8x32xf32>
    %14 = arith.subf %3, %13 : vector<8x32xf32>
    %15 = arith.mulf %14, %14 : vector<8x32xf32>
    %cst_9 = arith.constant dense<0.000000e+00> : vector<8xf32>
    %16 = vector.multi_reduction <add>, %15, %cst_9 [1] : vector<8x32xf32> to vector<8xf32>
    %17 = vector.shape_cast %16 : vector<8xf32> to vector<8x1xf32>
    %cst_10 = arith.constant 3.200000e+01 : f32
    %18 = vector.broadcast %cst_10 : f32 to vector<8x1xf32>
    %19 = arith.divf %17, %18 : vector<8x1xf32>
    %20 = vector.broadcast %12 : vector<8x1xf32> to vector<8x32xf32>
    %21 = arith.subf %3, %20 : vector<8x32xf32>
    %cst_11 = arith.constant 9.99999974E-6 : f32
    %22 = vector.broadcast %cst_11 : f32 to vector<8x1xf32>
    %23 = arith.addf %19, %22 : vector<8x1xf32>
    %24 = math.rsqrt %23 : vector<8x1xf32>
    %25 = vector.broadcast %24 : vector<8x1xf32> to vector<8x32xf32>
    %26 = arith.mulf %21, %25 : vector<8x32xf32>
    %27 = vector.broadcast %7 : vector<1x32xf32> to vector<8x32xf32>
    %28 = arith.mulf %26, %27 : vector<8x32xf32>
    %29 = vector.broadcast %8 : vector<1x32xf32> to vector<8x32xf32>
    %30 = arith.addf %28, %29 : vector<8x32xf32>
    %cst_12 = arith.constant dense<0.000000e+00> : vector<8xf32>
    %31 = vector.multi_reduction <add>, %6, %cst_12 [1] : vector<8x32xf32> to vector<8xf32>
    %32 = vector.shape_cast %31 : vector<8xf32> to vector<8x1xf32>
    %cst_13 = arith.constant 3.200000e+01 : f32
    %33 = vector.broadcast %cst_13 : f32 to vector<8x1xf32>
    %34 = arith.divf %32, %33 : vector<8x1xf32>
    %35 = vector.broadcast %34 : vector<8x1xf32> to vector<8x32xf32>
    %36 = arith.subf %6, %35 : vector<8x32xf32>
    %37 = arith.mulf %36, %36 : vector<8x32xf32>
    %cst_14 = arith.constant dense<0.000000e+00> : vector<8xf32>
    %38 = vector.multi_reduction <add>, %37, %cst_14 [1] : vector<8x32xf32> to vector<8xf32>
    %39 = vector.shape_cast %38 : vector<8xf32> to vector<8x1xf32>
    %cst_15 = arith.constant 3.200000e+01 : f32
    %40 = vector.broadcast %cst_15 : f32 to vector<8x1xf32>
    %41 = arith.divf %39, %40 : vector<8x1xf32>
    %42 = vector.broadcast %34 : vector<8x1xf32> to vector<8x32xf32>
    %43 = arith.subf %6, %42 : vector<8x32xf32>
    %cst_16 = arith.constant 9.99999974E-6 : f32
    %44 = vector.broadcast %cst_16 : f32 to vector<8x1xf32>
    %45 = arith.addf %41, %44 : vector<8x1xf32>
    %46 = math.rsqrt %45 : vector<8x1xf32>
    %47 = vector.broadcast %46 : vector<8x1xf32> to vector<8x32xf32>
    %48 = arith.mulf %43, %47 : vector<8x32xf32>
    %49 = vector.broadcast %7 : vector<1x32xf32> to vector<8x32xf32>
    %50 = arith.mulf %48, %49 : vector<8x32xf32>
    %51 = vector.broadcast %8 : vector<1x32xf32> to vector<8x32xf32>
    %52 = arith.addf %50, %51 : vector<8x32xf32>
    %53 = arith.truncf %52 : vector<8x32xf32> to vector<8x32xbf16>
    %c0_17 = arith.constant 0 : index
    %c0_18 = arith.constant 0 : index
    %54 = vector.load %arg3[%c0_17, %c0_18] : memref<32x32xbf16, #tpu.memory_space<vmem>>, vector<32x32xbf16>
    %cst_19 = arith.constant dense<0.000000e+00> : vector<8x32xf32>
    %55 = tpu.matmul %53, %54, %cst_19 {dimension_numbers = #tpu.dot_dimension_numbers<[1], [0], [0], [1], [0, 0, 1, 1], [], []>} : vector<8x32xbf16>, vector<32x32xbf16>, vector<8x32xf32> -> vector<8x32xf32>
    %cst_20 = arith.constant 0.176776692 : f32
    %56 = vector.broadcast %cst_20 : f32 to vector<8x32xf32>
    %57 = arith.mulf %55, %56 : vector<8x32xf32>
    %58 = arith.truncf %30 : vector<8x32xf32> to vector<8x32xbf16>
    %c0_21 = arith.constant 0 : index
    %c0_22 = arith.constant 0 : index
    %59 = vector.load %arg4[%c0_21, %c0_22] : memref<32x64xbf16, #tpu.memory_space<vmem>>, vector<32x64xbf16>
    %cst_23 = arith.constant dense<0.000000e+00> : vector<8x64xf32>
    %60 = tpu.matmul %58, %59, %cst_23 {dimension_numbers = #tpu.dot_dimension_numbers<[1], [0], [0], [1], [0, 0, 1, 1], [], []>} : vector<8x32xbf16>, vector<32x64xbf16>, vector<8x64xf32> -> vector<8x64xf32>
    %61 = vector.extract_strided_slice %60 {offsets = [0, 0], sizes = [8, 32], strides = [1, 1]} : vector<8x64xf32> to vector<8x32xf32>
    %62 = vector.extract_strided_slice %60 {offsets = [0, 32], sizes = [8, 32], strides = [1, 1]} : vector<8x64xf32> to vector<8x32xf32>
    %63 = tpu.iota {dimensions = array<i32: 0>} : vector<8x8xi32>
    %64 = vector.broadcast %1 : i32 to vector<8x8xi32>
    %65 = arith.addi %63, %64 : vector<8x8xi32>
    %66 = tpu.iota {dimensions = array<i32: 1>} : vector<8x8xi32>
    %67 = arith.cmpi sge, %65, %66 : vector<8x8xi32>
    %cst_24 = arith.constant 0.000000e+00 : f32
    %cst_25 = arith.constant -1.000000e+30 : f32
    %68 = vector.broadcast %cst_24 : f32 to vector<8x8xf32>
    %69 = vector.broadcast %cst_25 : f32 to vector<8x8xf32>
    %70 = arith.select %67, %68, %69 : vector<8x8xi1>, vector<8x8xf32>
    %c0_26 = arith.constant 0 : index
    %c0_27 = arith.constant 0 : index
    %71 = vector.load %arg5[%c0_26, %c0_27] : memref<32x32xbf16, #tpu.memory_space<vmem>>, vector<32x32xbf16>
    %cst_28 = arith.constant 0.000000e+00 : f32
    %72 = vector.broadcast %cst_28 : f32 to vector<8x32xf32>
    %73 = vector.extract_strided_slice %57 {offsets = [0, 0], sizes = [8, 8], strides = [1, 1]} : vector<8x32xf32> to vector<8x8xf32>
    %74 = arith.truncf %73 : vector<8x8xf32> to vector<8x8xbf16>
    %75 = vector.extract_strided_slice %61 {offsets = [0, 0], sizes = [8, 8], strides = [1, 1]} : vector<8x32xf32> to vector<8x8xf32>
    %76 = arith.truncf %75 : vector<8x8xf32> to vector<8x8xbf16>
    %77 = vector.extract_strided_slice %62 {offsets = [0, 0], sizes = [8, 8], strides = [1, 1]} : vector<8x32xf32> to vector<8x8xf32>
    %78 = arith.truncf %77 : vector<8x8xf32> to vector<8x8xbf16>
    %79 = tpu.transpose %76, [1, 0] : vector<8x8xbf16> -> vector<8x8xbf16>
    %cst_29 = arith.constant dense<0.000000e+00> : vector<8x8xf32>
    %80 = tpu.matmul %74, %79, %cst_29 {dimension_numbers = #tpu.dot_dimension_numbers<[1], [0], [0], [1], [0, 0, 1, 1], [], []>} : vector<8x8xbf16>, vector<8x8xbf16>, vector<8x8xf32> -> vector<8x8xf32>
    %81 = arith.addf %80, %70 : vector<8x8xf32>
    %cst_30 = arith.constant dense<0xFF800000> : vector<8xf32>
    %82 = vector.multi_reduction <maximumf>, %81, %cst_30 [1] : vector<8x8xf32> to vector<8xf32>
    %83 = vector.shape_cast %82 : vector<8xf32> to vector<8x1xf32>
    %84 = vector.broadcast %83 : vector<8x1xf32> to vector<8x8xf32>
    %85 = arith.subf %81, %84 : vector<8x8xf32>
    %86 = math.exp %85 : vector<8x8xf32>
    %cst_31 = arith.constant dense<0.000000e+00> : vector<8xf32>
    %87 = vector.multi_reduction <add>, %86, %cst_31 [1] : vector<8x8xf32> to vector<8xf32>
    %88 = vector.shape_cast %87 : vector<8xf32> to vector<8x1xf32>
    %89 = tpu.reciprocal %88 {approx = true} : vector<8x1xf32> -> vector<8x1xf32>
    %90 = vector.broadcast %89 : vector<8x1xf32> to vector<8x8xf32>
    %91 = arith.mulf %86, %90 : vector<8x8xf32>
    %92 = arith.truncf %91 : vector<8x8xf32> to vector<8x8xbf16>
    %cst_32 = arith.constant dense<0.000000e+00> : vector<8x8xf32>
    %93 = tpu.matmul %92, %78, %cst_32 {dimension_numbers = #tpu.dot_dimension_numbers<[1], [0], [0], [1], [0, 0, 1, 1], [], []>} : vector<8x8xbf16>, vector<8x8xbf16>, vector<8x8xf32> -> vector<8x8xf32>
    %94 = arith.truncf %93 : vector<8x8xf32> to vector<8x8xbf16>
    %95 = vector.extract_strided_slice %71 {offsets = [0, 0], sizes = [8, 32], strides = [1, 1]} : vector<32x32xbf16> to vector<8x32xbf16>
    %cst_33 = arith.constant dense<0.000000e+00> : vector<8x32xf32>
    %96 = tpu.matmul %94, %95, %cst_33 {dimension_numbers = #tpu.dot_dimension_numbers<[1], [0], [0], [1], [0, 0, 1, 1], [], []>} : vector<8x8xbf16>, vector<8x32xbf16>, vector<8x32xf32> -> vector<8x32xf32>
    %97 = arith.addf %72, %96 : vector<8x32xf32>
    %98 = vector.extract_strided_slice %57 {offsets = [0, 8], sizes = [8, 8], strides = [1, 1]} : vector<8x32xf32> to vector<8x8xf32>
    %99 = arith.truncf %98 : vector<8x8xf32> to vector<8x8xbf16>
    %100 = vector.extract_strided_slice %61 {offsets = [0, 8], sizes = [8, 8], strides = [1, 1]} : vector<8x32xf32> to vector<8x8xf32>
    %101 = arith.truncf %100 : vector<8x8xf32> to vector<8x8xbf16>
    %102 = vector.extract_strided_slice %62 {offsets = [0, 8], sizes = [8, 8], strides = [1, 1]} : vector<8x32xf32> to vector<8x8xf32>
    %103 = arith.truncf %102 : vector<8x8xf32> to vector<8x8xbf16>
    %104 = tpu.transpose %101, [1, 0] : vector<8x8xbf16> -> vector<8x8xbf16>
    %cst_34 = arith.constant dense<0.000000e+00> : vector<8x8xf32>
    %105 = tpu.matmul %99, %104, %cst_34 {dimension_numbers = #tpu.dot_dimension_numbers<[1], [0], [0], [1], [0, 0, 1, 1], [], []>} : vector<8x8xbf16>, vector<8x8xbf16>, vector<8x8xf32> -> vector<8x8xf32>
    %106 = arith.addf %105, %70 : vector<8x8xf32>
    %cst_35 = arith.constant dense<0xFF800000> : vector<8xf32>
    %107 = vector.multi_reduction <maximumf>, %106, %cst_35 [1] : vector<8x8xf32> to vector<8xf32>
    %108 = vector.shape_cast %107 : vector<8xf32> to vector<8x1xf32>
    %109 = vector.broadcast %108 : vector<8x1xf32> to vector<8x8xf32>
    %110 = arith.subf %106, %109 : vector<8x8xf32>
    %111 = math.exp %110 : vector<8x8xf32>
    %cst_36 = arith.constant dense<0.000000e+00> : vector<8xf32>
    %112 = vector.multi_reduction <add>, %111, %cst_36 [1] : vector<8x8xf32> to vector<8xf32>
    %113 = vector.shape_cast %112 : vector<8xf32> to vector<8x1xf32>
    %114 = tpu.reciprocal %113 {approx = true} : vector<8x1xf32> -> vector<8x1xf32>
    %115 = vector.broadcast %114 : vector<8x1xf32> to vector<8x8xf32>
    %116 = arith.mulf %111, %115 : vector<8x8xf32>
    %117 = arith.truncf %116 : vector<8x8xf32> to vector<8x8xbf16>
    %cst_37 = arith.constant dense<0.000000e+00> : vector<8x8xf32>
    %118 = tpu.matmul %117, %103, %cst_37 {dimension_numbers = #tpu.dot_dimension_numbers<[1], [0], [0], [1], [0, 0, 1, 1], [], []>} : vector<8x8xbf16>, vector<8x8xbf16>, vector<8x8xf32> -> vector<8x8xf32>
    %119 = arith.truncf %118 : vector<8x8xf32> to vector<8x8xbf16>
    %120 = vector.extract_strided_slice %71 {offsets = [8, 0], sizes = [8, 32], strides = [1, 1]} : vector<32x32xbf16> to vector<8x32xbf16>
    %cst_38 = arith.constant dense<0.000000e+00> : vector<8x32xf32>
    %121 = tpu.matmul %119, %120, %cst_38 {dimension_numbers = #tpu.dot_dimension_numbers<[1], [0], [0], [1], [0, 0, 1, 1], [], []>} : vector<8x8xbf16>, vector<8x32xbf16>, vector<8x32xf32> -> vector<8x32xf32>
    %122 = arith.addf %97, %121 : vector<8x32xf32>
    %123 = vector.extract_strided_slice %57 {offsets = [0, 16], sizes = [8, 8], strides = [1, 1]} : vector<8x32xf32> to vector<8x8xf32>
    %124 = arith.truncf %123 : vector<8x8xf32> to vector<8x8xbf16>
    %125 = vector.extract_strided_slice %61 {offsets = [0, 16], sizes = [8, 8], strides = [1, 1]} : vector<8x32xf32> to vector<8x8xf32>
    %126 = arith.truncf %125 : vector<8x8xf32> to vector<8x8xbf16>
    %127 = vector.extract_strided_slice %62 {offsets = [0, 16], sizes = [8, 8], strides = [1, 1]} : vector<8x32xf32> to vector<8x8xf32>
    %128 = arith.truncf %127 : vector<8x8xf32> to vector<8x8xbf16>
    %129 = tpu.transpose %126, [1, 0] : vector<8x8xbf16> -> vector<8x8xbf16>
    %cst_39 = arith.constant dense<0.000000e+00> : vector<8x8xf32>
    %130 = tpu.matmul %124, %129, %cst_39 {dimension_numbers = #tpu.dot_dimension_numbers<[1], [0], [0], [1], [0, 0, 1, 1], [], []>} : vector<8x8xbf16>, vector<8x8xbf16>, vector<8x8xf32> -> vector<8x8xf32>
    %131 = arith.addf %130, %70 : vector<8x8xf32>
    %cst_40 = arith.constant dense<0xFF800000> : vector<8xf32>
    %132 = vector.multi_reduction <maximumf>, %131, %cst_40 [1] : vector<8x8xf32> to vector<8xf32>
    %133 = vector.shape_cast %132 : vector<8xf32> to vector<8x1xf32>
    %134 = vector.broadcast %133 : vector<8x1xf32> to vector<8x8xf32>
    %135 = arith.subf %131, %134 : vector<8x8xf32>
    %136 = math.exp %135 : vector<8x8xf32>
    %cst_41 = arith.constant dense<0.000000e+00> : vector<8xf32>
    %137 = vector.multi_reduction <add>, %136, %cst_41 [1] : vector<8x8xf32> to vector<8xf32>
    %138 = vector.shape_cast %137 : vector<8xf32> to vector<8x1xf32>
    %139 = tpu.reciprocal %138 {approx = true} : vector<8x1xf32> -> vector<8x1xf32>
    %140 = vector.broadcast %139 : vector<8x1xf32> to vector<8x8xf32>
    %141 = arith.mulf %136, %140 : vector<8x8xf32>
    %142 = arith.truncf %141 : vector<8x8xf32> to vector<8x8xbf16>
    %cst_42 = arith.constant dense<0.000000e+00> : vector<8x8xf32>
    %143 = tpu.matmul %142, %128, %cst_42 {dimension_numbers = #tpu.dot_dimension_numbers<[1], [0], [0], [1], [0, 0, 1, 1], [], []>} : vector<8x8xbf16>, vector<8x8xbf16>, vector<8x8xf32> -> vector<8x8xf32>
    %144 = arith.truncf %143 : vector<8x8xf32> to vector<8x8xbf16>
    %145 = vector.extract_strided_slice %71 {offsets = [16, 0], sizes = [8, 32], strides = [1, 1]} : vector<32x32xbf16> to vector<8x32xbf16>
    %cst_43 = arith.constant dense<0.000000e+00> : vector<8x32xf32>
    %146 = tpu.matmul %144, %145, %cst_43 {dimension_numbers = #tpu.dot_dimension_numbers<[1], [0], [0], [1], [0, 0, 1, 1], [], []>} : vector<8x8xbf16>, vector<8x32xbf16>, vector<8x32xf32> -> vector<8x32xf32>
    %147 = arith.addf %122, %146 : vector<8x32xf32>
    %148 = vector.extract_strided_slice %57 {offsets = [0, 24], sizes = [8, 8], strides = [1, 1]} : vector<8x32xf32> to vector<8x8xf32>
    %149 = arith.truncf %148 : vector<8x8xf32> to vector<8x8xbf16>
    %150 = vector.extract_strided_slice %61 {offsets = [0, 24], sizes = [8, 8], strides = [1, 1]} : vector<8x32xf32> to vector<8x8xf32>
    %151 = arith.truncf %150 : vector<8x8xf32> to vector<8x8xbf16>
    %152 = vector.extract_strided_slice %62 {offsets = [0, 24], sizes = [8, 8], strides = [1, 1]} : vector<8x32xf32> to vector<8x8xf32>
    %153 = arith.truncf %152 : vector<8x8xf32> to vector<8x8xbf16>
    %154 = tpu.transpose %151, [1, 0] : vector<8x8xbf16> -> vector<8x8xbf16>
    %cst_44 = arith.constant dense<0.000000e+00> : vector<8x8xf32>
    %155 = tpu.matmul %149, %154, %cst_44 {dimension_numbers = #tpu.dot_dimension_numbers<[1], [0], [0], [1], [0, 0, 1, 1], [], []>} : vector<8x8xbf16>, vector<8x8xbf16>, vector<8x8xf32> -> vector<8x8xf32>
    %156 = arith.addf %155, %70 : vector<8x8xf32>
    %cst_45 = arith.constant dense<0xFF800000> : vector<8xf32>
    %157 = vector.multi_reduction <maximumf>, %156, %cst_45 [1] : vector<8x8xf32> to vector<8xf32>
    %158 = vector.shape_cast %157 : vector<8xf32> to vector<8x1xf32>
    %159 = vector.broadcast %158 : vector<8x1xf32> to vector<8x8xf32>
    %160 = arith.subf %156, %159 : vector<8x8xf32>
    %161 = math.exp %160 : vector<8x8xf32>
    %cst_46 = arith.constant dense<0.000000e+00> : vector<8xf32>
    %162 = vector.multi_reduction <add>, %161, %cst_46 [1] : vector<8x8xf32> to vector<8xf32>
    %163 = vector.shape_cast %162 : vector<8xf32> to vector<8x1xf32>
    %164 = tpu.reciprocal %163 {approx = true} : vector<8x1xf32> -> vector<8x1xf32>
    %165 = vector.broadcast %164 : vector<8x1xf32> to vector<8x8xf32>
    %166 = arith.mulf %161, %165 : vector<8x8xf32>
    %167 = arith.truncf %166 : vector<8x8xf32> to vector<8x8xbf16>
    %cst_47 = arith.constant dense<0.000000e+00> : vector<8x8xf32>
    %168 = tpu.matmul %167, %153, %cst_47 {dimension_numbers = #tpu.dot_dimension_numbers<[1], [0], [0], [1], [0, 0, 1, 1], [], []>} : vector<8x8xbf16>, vector<8x8xbf16>, vector<8x8xf32> -> vector<8x8xf32>
    %169 = arith.truncf %168 : vector<8x8xf32> to vector<8x8xbf16>
    %170 = vector.extract_strided_slice %71 {offsets = [24, 0], sizes = [8, 32], strides = [1, 1]} : vector<32x32xbf16> to vector<8x32xbf16>
    %cst_48 = arith.constant dense<0.000000e+00> : vector<8x32xf32>
    %171 = tpu.matmul %169, %170, %cst_48 {dimension_numbers = #tpu.dot_dimension_numbers<[1], [0], [0], [1], [0, 0, 1, 1], [], []>} : vector<8x8xbf16>, vector<8x32xbf16>, vector<8x32xf32> -> vector<8x32xf32>
    %172 = arith.addf %147, %171 : vector<8x32xf32>
    %173 = arith.addf %6, %172 : vector<8x32xf32>
    %c0_49 = arith.constant 0 : index
    %c0_50 = arith.constant 0 : index
    %174 = vector.load %arg6[%c0_49, %c0_50] : memref<1x32xf32, #tpu.memory_space<vmem>>, vector<1x32xf32>
    %175 = vector.broadcast %174 : vector<1x32xf32> to vector<8x32xf32>
    %176 = arith.addf %173, %175 : vector<8x32xf32>
    %c0_51 = arith.constant 0 : index
    %c0_52 = arith.constant 0 : index
    %177 = vector.load %arg9[%c0_51, %c0_52] : memref<1x32xf32, #tpu.memory_space<vmem>>, vector<1x32xf32>
    %c0_53 = arith.constant 0 : index
    %c0_54 = arith.constant 0 : index
    %178 = vector.load %arg10[%c0_53, %c0_54] : memref<1x32xf32, #tpu.memory_space<vmem>>, vector<1x32xf32>
    %cst_55 = arith.constant dense<0.000000e+00> : vector<8xf32>
    %179 = vector.multi_reduction <add>, %176, %cst_55 [1] : vector<8x32xf32> to vector<8xf32>
    %180 = vector.shape_cast %179 : vector<8xf32> to vector<8x1xf32>
    %cst_56 = arith.constant 3.200000e+01 : f32
    %181 = vector.broadcast %cst_56 : f32 to vector<8x1xf32>
    %182 = arith.divf %180, %181 : vector<8x1xf32>
    %183 = vector.broadcast %182 : vector<8x1xf32> to vector<8x32xf32>
    %184 = arith.subf %176, %183 : vector<8x32xf32>
    %185 = arith.mulf %184, %184 : vector<8x32xf32>
    %cst_57 = arith.constant dense<0.000000e+00> : vector<8xf32>
    %186 = vector.multi_reduction <add>, %185, %cst_57 [1] : vector<8x32xf32> to vector<8xf32>
    %187 = vector.shape_cast %186 : vector<8xf32> to vector<8x1xf32>
    %cst_58 = arith.constant 3.200000e+01 : f32
    %188 = vector.broadcast %cst_58 : f32 to vector<8x1xf32>
    %189 = arith.divf %187, %188 : vector<8x1xf32>
    %190 = vector.broadcast %182 : vector<8x1xf32> to vector<8x32xf32>
    %191 = arith.subf %176, %190 : vector<8x32xf32>
    %cst_59 = arith.constant 9.99999974E-6 : f32
    %192 = vector.broadcast %cst_59 : f32 to vector<8x1xf32>
    %193 = arith.addf %189, %192 : vector<8x1xf32>
    %194 = math.rsqrt %193 : vector<8x1xf32>
    %195 = vector.broadcast %194 : vector<8x1xf32> to vector<8x32xf32>
    %196 = arith.mulf %191, %195 : vector<8x32xf32>
    %197 = vector.broadcast %177 : vector<1x32xf32> to vector<8x32xf32>
    %198 = arith.mulf %196, %197 : vector<8x32xf32>
    %199 = vector.broadcast %178 : vector<1x32xf32> to vector<8x32xf32>
    %200 = arith.addf %198, %199 : vector<8x32xf32>
    %201 = arith.truncf %200 : vector<8x32xf32> to vector<8x32xbf16>
    %c0_60 = arith.constant 0 : index
    %c0_61 = arith.constant 0 : index
    %202 = vector.load %arg11[%c0_60, %c0_61] : memref<32x128xbf16, #tpu.memory_space<vmem>>, vector<32x128xbf16>
    %cst_62 = arith.constant dense<0.000000e+00> : vector<8x128xf32>
    %203 = tpu.matmul %201, %202, %cst_62 {dimension_numbers = #tpu.dot_dimension_numbers<[1], [0], [0], [1], [0, 0, 1, 1], [], []>} : vector<8x32xbf16>, vector<32x128xbf16>, vector<8x128xf32> -> vector<8x128xf32>
    %c0_63 = arith.constant 0 : index
    %c0_64 = arith.constant 0 : index
    %204 = vector.load %arg12[%c0_63, %c0_64] : memref<1x128xf32, #tpu.memory_space<vmem>>, vector<1x128xf32>
    %205 = vector.broadcast %204 : vector<1x128xf32> to vector<8x128xf32>
    %206 = arith.addf %203, %205 : vector<8x128xf32>
    %cst_65 = arith.constant 0.000000e+00 : f32
    %207 = vector.broadcast %cst_65 : f32 to vector<8x128xf32>
    %208 = arith.maximumf %206, %207 : vector<8x128xf32>
    %209 = arith.truncf %208 : vector<8x128xf32> to vector<8x128xbf16>
    %c0_66 = arith.constant 0 : index
    %c0_67 = arith.constant 0 : index
    %210 = vector.load %arg13[%c0_66, %c0_67] : memref<128x32xbf16, #tpu.memory_space<vmem>>, vector<128x32xbf16>
    %cst_68 = arith.constant dense<0.000000e+00> : vector<8x32xf32>
    %211 = tpu.matmul %209, %210, %cst_68 {dimension_numbers = #tpu.dot_dimension_numbers<[1], [0], [0], [1], [0, 0, 1, 1], [], []>} : vector<8x128xbf16>, vector<128x32xbf16>, vector<8x32xf32> -> vector<8x32xf32>
    %c0_69 = arith.constant 0 : index
    %c0_70 = arith.constant 0 : index
    %212 = vector.load %arg14[%c0_69, %c0_70] : memref<1x32xf32, #tpu.memory_space<vmem>>, vector<1x32xf32>
    %213 = vector.broadcast %212 : vector<1x32xf32> to vector<8x32xf32>
    %214 = arith.addf %211, %213 : vector<8x32xf32>
    %215 = arith.addf %176, %214 : vector<8x32xf32>
    %c0_71 = arith.constant 0 : index
    %c0_72 = arith.constant 0 : index
    %c0_73 = arith.constant 0 : index
    %216 = vector.load %arg15[%c0_71, %c0_72, %c0_73] : memref<1x8x32xf32, #tpu.memory_space<vmem>>, vector<1x8x32xf32>
    %217 = vector.shape_cast %216 : vector<1x8x32xf32> to vector<8x32xf32>
    %218 = vector.shape_cast %215 : vector<8x32xf32> to vector<1x8x32xf32>
    tpu.vector_store %arg15[%c0_71, %c0_72, %c0_73], %218 {strides = array<i32>} : memref<1x8x32xf32, #tpu.memory_space<vmem>>, vector<1x8x32xf32>,
    return
  }
  func.func @transform_0(%arg0: i32, %arg1: i32) -> (i32, i32, i32) {
    %c0_i32 = arith.constant 0 : i32
    %c0_i32_0 = arith.constant 0 : i32
    %c0_i32_1 = arith.constant 0 : i32
    return %arg0, %c0_i32, %c0_i32_0 : i32, i32, i32
  }
  func.func @transform_1(%arg0: i32, %arg1: i32) -> (i32, i32) {
    %c0_i32 = arith.constant 0 : i32
    %c0_i32_0 = arith.constant 0 : i32
    %c0_i32_1 = arith.constant 0 : i32
    return %c0_i32, %c0_i32_0 : i32, i32
  }
  func.func @transform_2(%arg0: i32, %arg1: i32) -> (i32, i32) {
    %c0_i32 = arith.constant 0 : i32
    %c0_i32_0 = arith.constant 0 : i32
    %c0_i32_1 = arith.constant 0 : i32
    return %c0_i32, %c0_i32_0 : i32, i32
  }
  func.func @transform_3(%arg0: i32, %arg1: i32) -> (i32, i32) {
    %c0_i32 = arith.constant 0 : i32
    %c0_i32_0 = arith.constant 0 : i32
    %c0_i32_1 = arith.constant 0 : i32
    return %c0_i32, %c0_i32_0 : i32, i32
  }
  func.func @transform_4(%arg0: i32, %arg1: i32) -> (i32, i32) {
    %c0_i32 = arith.constant 0 : i32
    %c0_i32_0 = arith.constant 0 : i32
    %c0_i32_1 = arith.constant 0 : i32
    return %c0_i32, %c0_i32_0 : i32, i32
  }
  func.func @transform_5(%arg0: i32, %arg1: i32) -> (i32, i32) {
    %c0_i32 = arith.constant 0 : i32
    %c0_i32_0 = arith.constant 0 : i32
    %c0_i32_1 = arith.constant 0 : i32
    return %c0_i32, %c0_i32_0 : i32, i32
  }
  func.func @transform_6(%arg0: i32, %arg1: i32) -> (i32, i32) {
    %c0_i32 = arith.constant 0 : i32
    %c0_i32_0 = arith.constant 0 : i32
    %c0_i32_1 = arith.constant 0 : i32
    return %c0_i32, %c0_i32_0 : i32, i32
  }
  func.func @transform_7(%arg0: i32, %arg1: i32) -> (i32, i32) {
    %c0_i32 = arith.constant 0 : i32
    %c0_i32_0 = arith.constant 0 : i32
    %c0_i32_1 = arith.constant 0 : i32
    return %c0_i32, %c0_i32_0 : i32, i32
  }
  func.func @transform_8(%arg0: i32, %arg1: i32) -> (i32, i32) {
    %c0_i32 = arith.constant 0 : i32
    %c0_i32_0 = arith.constant 0 : i32
    %c0_i32_1 = arith.constant 0 : i32
    return %c0_i32, %c0_i32_0 : i32, i32
  }
  func.func @transform_9(%arg0: i32, %arg1: i32) -> (i32, i32) {
    %c0_i32 = arith.constant 0 : i32
    %c0_i32_0 = arith.constant 0 : i32
    %c0_i32_1 = arith.constant 0 : i32
    return %c0_i32, %c0_i32_0 : i32, i32
  }
  func.func @transform_10(%arg0: i32, %arg1: i32) -> (i32, i32) {
    %c0_i32 = arith.constant 0 : i32
    %c0_i32_0 = arith.constant 0 : i32
    %c0_i32_1 = arith.constant 0 : i32
    return %c0_i32, %c0_i32_0 : i32, i32
  }
  func.func @transform_11(%arg0: i32, %arg1: i32) -> (i32, i32) {
    %c0_i32 = arith.constant 0 : i32
    %c0_i32_0 = arith.constant 0 : i32
    %c0_i32_1 = arith.constant 0 : i32
    return %c0_i32, %c0_i32_0 : i32, i32
  }
  func.func @transform_12(%arg0: i32, %arg1: i32) -> (i32, i32) {
    %c0_i32 = arith.constant 0 : i32
    %c0_i32_0 = arith.constant 0 : i32
    %c0_i32_1 = arith.constant 0 : i32
    return %c0_i32, %c0_i32_0 : i32, i32
  }
  func.func @transform_13(%arg0: i32, %arg1: i32) -> (i32, i32, i32) {
    %c0_i32 = arith.constant 0 : i32
    %c0_i32_0 = arith.constant 0 : i32
    return %arg0, %arg1, %c0_i32 : i32, i32, i32
  }
}

</mosaic_0001>

<bundles_post_ra>
// kernel: tpu_custom_call.1
= control target key start
LH: loop header
LB: loop body
LE: loop exit
PB: predicated region body
PF: predicated region fallthrough
CT: control target
= control target key end

     0   :  { %s2360_s0 = inlined_call_operand.vmem [shape: f32[2,8,32], index: 0, kind: input, shape index: {}]   ;;  %s2361_s1 = inlined_call_operand.vmem [shape: bf16[32,32], index: 1, kind: input, shape index: {}]   ;;  %s2362_s2 = inlined_call_operand.vmem [shape: bf16[32,64], index: 2, kind: input, shape index: {}]   ;;  %s2363_s3 = inlined_call_operand.vmem [shape: bf16[32,32], index: 3, kind: input, shape index: {}]   ;;  %s2364_s4 = inlined_call_operand.vmem [shape: f32[1,32], index: 4, kind: input, shape index: {}]   ;;  %s2365_s5 = inlined_call_operand.vmem [shape: f32[1,32], index: 5, kind: input, shape index: {}]   ;;  %s2366_s6 = inlined_call_operand.vmem [shape: f32[1,32], index: 6, kind: input, shape index: {}]   ;;  %s2367_s7 = inlined_call_operand.vmem [shape: f32[1,32], index: 7, kind: input, shape index: {}]   ;;  %s2368_s8 = inlined_call_operand.vmem [shape: f32[1,32], index: 8, kind: input, shape index: {}]   ;;  %s2369_s9 = inlined_call_operand.vmem [shape: bf16[32,128], index: 9, kind: input, shape index: {}]   ;;  %s2370_s10 = inlined_call_operand.vmem [shape: f32[1,128], index: 10, kind: input, shape index: {}]   ;;  %s2371_s11 = inlined_call_operand.vmem [shape: bf16[128,32], index: 11, kind: input, shape index: {}]   ;;  %s2372_s12 = inlined_call_operand.vmem [shape: f32[1,32], index: 12, kind: input, shape index: {}]   ;;  %s2373_s13 = inlined_call_operand.hbm [shape: f32[2,8,32], index: 13, kind: output, shape index: {}]  }
   0x1   :  { %2374 = sst [smem:[#allocation5_spill]] %s2360_s0 }
   0x2   :  { %2375 = sst [smem:[#allocation6_spill]] %s2361_s1 }
   0x3   :  { %2376 = sst [smem:[#allocation7_spill]] %s2362_s2 }
   0x4   :  { %2377 = sst [smem:[#allocation8_spill]] %s2363_s3 }
   0x5   :  { %18 = vsyncpa [#allocation3], 0 }
   0x6   :  { %20 = vsyncpa [#allocation3 + $0x1], 0  ;;  %s2038_s25 = smov 0   ;;  %s2040_s26 = smov 0  }
   0x7   :  { %s2042_s27 = smov 0   ;;  %s2044_s28 = smov 0  }
   0x8   :  { %s2046_s29 = smov 0   ;;  %s2048_s30 = smov 0  }
   0x9 LB: > { %s1571_s14 = sadd.s32 4294967295, %s1955_s30   ;;  %s1572_s15 = sadd.s32 4294967294, %s1955_s30   ;;  %s1955_s30 = sphi %s2048_s30, %s26_s30   ;;  %s1951_s29 = sphi %s2046_s29, %s2388_s29   ;;  %s1947_s28 = sphi %s2044_s28, %s2387_s28   ;;  %s1943_s27 = sphi %s2042_s27, %s2386_s27   ;;  %s1939_s26 = sphi %s2040_s26, %s2385_s26   ;;  %s1935_s25 = sphi %s2038_s25, %s2384_s25  }
   0xa   : > { %s38_s16 = sadd.s32 1, %s1951_s29  ;;  %s325_s17 = sadd.s32 1, %s1943_s27 }
   0xb   : > { %p40_p0 = scmp.ge.s32.totalorder %s38_s16, 2  ;;  %p335_p1 = scmp.ne.s32.totalorder %s1943_s27, %s1939_s26 }
   0xc   : > { %p336_p2 = scmp.eq.s32.totalorder %s1571_s14, 1  ;;  %p341_p3 = scmp.ne.s32.totalorder %s1939_s26, %s1935_s25 }
   0xd   : > { %s2390_s16 = smov (%p40_p0, %s38_s16), 0  ;;  %p342_p5 = scmp.eq.s32.totalorder %s1572_s15, 1 }
   0xe   : > { %p2078_p4 = por %p336_p2, %p335_p1  ;;  %s320_s19 = ssub.s32 %s1951_s29, %s2390_s16 }
   0xf   : > { %p1575_p6 = scmp.ge.s32.totalorder %s1955_s30, 1  ;;  %p323_p7 = scmp.eq.s32.totalorder %s320_s19, 0 }
  0x10   : > { %p2085_p8 = por %p342_p5, %p341_p3  ;;  %p403_p9 = scmp.lt.s32.totalorder %s1955_s30, 3 }
  0x11   : > { %s2091_s21 = scalar_select %p323_p7, %s1943_s27, %s325_s17  }
  0x12   : > { %p404_p10 = pnand %p1575_p6, %p403_p9 }
  0x13   : > { %p446_p11 = scmp.lt.s32.totalorder (!%p404_p10), %s1947_s28, 1  ;;  %vm457_vm0 = vcmask (!%p404_p10), 261120   ;;  %s2380_s0 = sld [smem:[#allocation5_spill]] (!%p404_p10)  ;;  %v1957_v13 = vmov (!%p404_p10), 0.0   ;;  %vm1958_vm1 = vmmov (!%p404_p10), 0   ;;  %vm636_vm2 = vcmask (!%p404_p10), 64512  }
  0x14   : > { %407 = sbr.rel (%p404_p10) target bundleno = 3707 (0xe7b), region = 72  ;;  %s2381_s1 = sld [smem:[#allocation6_spill]] (!%p404_p10)  ;;  %1660 = vmatprep.subr.bf16.mxu0 (!%p404_p10), %v1957_v13  ;;  %1682 = vmatprep.subr.bf16.mxu1 (!%p404_p10), %v1957_v13  ;;  %v1578_v22 = vld [vmem:[%s2365_s5] ss:$0 sm:$0xff] (!%p404_p10)  ;;  %v622_v50 = vlaneseq (!%p404_p10)  ;;  %v1960_v53 = vmov (!%p404_p10), -1e+30  }
  0x15   : > { %1664 = vmatprep.mubr.msk.bf16.mxu0 (!%p404_p10), %vm1958_vm1, %v1957_v13  ;;  %1684 = vmatprep.mubr.msk.bf16.mxu1 (!%p404_p10), %vm1958_vm1, %v1957_v13  ;;  %v1579_v24 = vld [vmem:[%s2366_s6] ss:$0 sm:$0xff] (!%p404_p10)  ;;  %s2382_s2 = sld [smem:[#allocation7_spill]] (!%p404_p10)  ;;  %s1959_s14 = smov (!%p404_p10), 120   ;;  %vm701_vm4 = vcmask (!%p404_p10), 1043456  }
  0x16   : > { %v623_v51 = vshrl.u32 (!%p404_p10), %v622_v50, 7  ;;  %v627_v52 = vand.u32 (!%p404_p10), 127, %v622_v50  ;;  %s1962_s17 = smov (!%p404_p10), 88   ;;  %s1963_s19 = smov (!%p404_p10), 112  }
  0x17   : > { %s2383_s3 = sld [smem:[#allocation8_spill]] (!%p404_p10) }
  0x18   : > { %vm628_vm3 = vcmp.ge.s32.totalorder (!%p404_p10), %v623_v51, %v627_v52 }
  0x19   : > { %v2158_v54 = vsel (!%p404_p10), %vm628_vm3, 0.0, %v1960_v53 }
  0x1a   : > { %v1841_v12 = vld [vmem:[%s2381_s1] sm:$0xff] (!%p404_p10)   ;;  %v1842_v14 = vld [vmem:[%s2381_s1 + $0x8] sm:$0xff] (!%p404_p10)  }
  0x1b   : > { %s447_s22 = scalar_select %p446_p11, %s1947_s28, 1  ;;  %1661 = vmatpush3.bf16.msra.mxu0 %v1841_v12  ;;  %v1843_v29 = vld [vmem:[%s2382_s2] sm:$0xff]   ;;  %v1844_v32 = vld [vmem:[%s2382_s2 + $0x8] sm:$0xff]  }
  0x1c   : > { %1662 = vmatprep.subr.bf16.mxu0 %v1957_v13 }
  0x1d   : > { %s1577_s23 = sshll.u32 %s447_s22, 3 }
  0x1e   : > { %s449_s15 = scalar_lea.vmem %s2380_s0, %s1577_s23  ;;  %s1966_s23 = smov 72  }
  0x1f   : > { %v2098_v0 = vld [vmem:[%s449_s15] sm:$0xff]  ;;  %1663 = vmatpush3.bf16.msra.mxu0 %v1842_v14  ;;  %s1961_s15 = smov 96  }
  0x20   : > { %v486_v1 = vsel %vm457_vm0, %v2098_v0, 0.0  ;;  %1668 = vmatprep.subr.bf16.mxu0 %v1957_v13 }
  0x21   : > { %487 = vadd.xlane.f32.xlu0 %v486_v1 }
  0x25   : > { %459 = vadd.xlane.f32.xlu0 %v486_v1 }
  0xae   : > { %v488_v2 = vpop.xlane.xlu0 %487 }
  0xaf   : > { %v489_v3 = vmul.f32 0.03125, %v488_v2 }
  0xb1   : > { %v490_v4 = vsub.f32 %v2098_v0, %v489_v3 }
  0xb2   : > { %v460_v5 = vpop.xlane.xlu0 %459 }
  0xb3   : > { %v462_v6 = vmul.f32 0.03125, %v460_v5  ;;  %v491_v7 = vmul.f32 %v490_v4, %v490_v4 }
  0xb5   : > { %v463_v8 = vsub.f32 %v2098_v0, %v462_v6  ;;  %v492_v9 = vsel %vm457_vm0, %v491_v7, 0.0 }
  0xb6   : > { %493 = vadd.xlane.f32.xlu1 %v492_v9 }
  0xb7   : > { %v464_v10 = vmul.f32 %v463_v8, %v463_v8 }
  0xb9   : > { %v465_v11 = vsel %vm457_vm0, %v464_v10, 0.0 }
  0xba   : > { %466 = vadd.xlane.f32.xlu1 %v465_v11 }
 0x143   : > { %v494_v15 = vpop.xlane.xlu1 %493 }
 0x144   : > { %v495_v16 = vmul.f32 0.03125, %v494_v15 }
 0x146   : > { %v496_v17 = vadd.f32 1e-05, %v495_v16 }
 0x147   : > { %v467_v18 = vpop.xlane.xlu1 %466 }
 0x148   : > { %1855 = vrsqrt.f32 %v496_v17  ;;  %v468_v19 = vmul.f32 0.03125, %v467_v18 }
 0x14a   : > { %v469_v20 = vadd.f32 1e-05, %v468_v19 }
 0x14c   : > { %1857 = vrsqrt.f32 %v469_v20 }
 0x152   : > { %v1856_v21 = vpop.eup %1855 }
 0x153   : > { %v498_v23 = vmul.f32 %v1856_v21, %v490_v4  ;;  %v631_v21 = vld [vmem:[%s2383_s3 + $0x4] sm:$0xf] }
 0x155   : > { %v499_v25 = vmul.f32 %v1578_v22, %v498_v23 }
 0x156   : > { %v1858_v26 = vpop.eup %1857 }
 0x157   : > { %v471_v27 = vmul.f32 %v1858_v26, %v463_v8  ;;  %v500_v28 = vadd.f32 %v1579_v24, %v499_v25 }
 0x159   : > { %v478_v30 = vmul.f32 %v1578_v22, %v471_v27  ;;  %v501_v31 = vpack.c.bf16 %v500_v28, %v500_v28  ;;  %v862_v22 = vsel %vm701_vm4, %v631_v21, 0  ;;  %v630_v27 = vld [vmem:[%s2383_s3] sm:$0xf] }
 0x15b   : > { %1665 = vmatmul.mubr.msk.bf16.vlgmr.msra.gmra.mrb[0].mxu0 %vm457_vm0, %v501_v31  ;;  %v485_v33 = vadd.f32 %v1579_v24, %v478_v30  ;;  %v908_v30 = vsel %vm701_vm4, %v630_v27, 0 }
 0x15c   : > { %1669 = vmatpush3.bf16.msra.mxu0 %v1843_v29  ;;  %1672 = vmatprep.mubr.msk.bf16.mxu0 %vm1958_vm1, %v1957_v13 }
 0x15d   : > { %1670 = vmatprep.subr.bf16.mxu0 %v1957_v13  ;;  %v562_v34 = vpack.c.bf16 %v485_v33, %v485_v33 }
 0x160   : > { %1671 = vmatpush3.bf16.msra.mxu0 %v1844_v32 }
 0x161   : > { %1676 = vmatprep.subr.bf16.mxu0 %v1957_v13 }
 0x163   : > { %1673 = vmatmul.mubr.msk.bf16.vlgmr.msra.gmra.mrb[4].mxu0 %vm457_vm0, %v562_v34 }
 0x164   : > { %1678 = vmatprep.mubr.msk.bf16.mxu0 %vm1958_vm1, %v1957_v13 }
 0x22e   : > { %v555_v35 = vpop.f32.mrb[0].mxu0 }
 0x22f   : > { %v561_v36 = vmul.f32 0.17677669, %v555_v35  ;;  %v1666_v37 = vpop.f32.mrb[1].mxu0 }
 0x230   : > { %v558_v38 = vpop.f32.mrb[2].mxu0 }
 0x231   : > { %v2140_v39 = vpack.c.bf16 %v561_v36, %v561_v36  ;;  %v1667_v40 = vpop.f32.mrb[3].mxu0 }
 0x233   : > { %747 = vrot.lane.b32.xlu1 %v2140_v39, %s1959_s14 }
 0x236   : > { %v616_v41 = vpop.f32.mrb[4].mxu0 }
 0x237   : > { %v2143_v42 = vpack.c.bf16 %v616_v41, %v616_v41  ;;  %v1674_v43 = vpop.f32.mrb[5].mxu0 }
 0x238   : > { %v619_v44 = vpop.f32.mrb[6].mxu0 }
 0x239   : > { %749 = vrot.lane.b32.xlu0 %v2143_v42, %s1959_s14  ;;  %v1675_v45 = vpop.f32.mrb[7].mxu0  ;;  %v641_v46 = vsel %vm636_vm2, %v2143_v42, 0  ;;  %s1967_s14 = smov [#allocation2]  }
 0x23a   : > { %1677 = vmatpush3.bf16.xpose.msra.mxu0 %v641_v46  ;;  %s1881_s0 = sshll.u32 %s1967_s14, 4  ;;  %s1882_s0 = int_to_ptr.vmem [resolvable:$false] %s1881_s0 }
 0x23b   : > { %1688 = vmatprep.subr.bf16.mxu0 %v1957_v13 }
 0x241   : > { %1679 = vmatmul.mubr.msk.bf16.vlgmr.msra.gmra.mrb[8].mxu0 %vm636_vm2, %v2140_v39 }
 0x242   : > { %1690 = vmatprep.mubr.msk.bf16.mxu0 %vm1958_vm1, %v1957_v13 }
 0x2a5   : > { %v748_v49 = vpop.permute.xlu1 %747 }
 0x2ab   : > { %v750_v47 = vpop.permute.xlu0 %749 }
 0x2ac   : > { %v755_v48 = vsel %vm636_vm2, %v750_v47, 0 }
 0x2ad   : > { %1689 = vmatpush3.bf16.xpose.msra.mxu0 %v755_v48 }
 0x2ae   : > { %1700 = vmatprep.subr.bf16.mxu0 %v1957_v13 }
 0x2b4   : > { %1691 = vmatmul.mubr.msk.bf16.vlgmr.msra.gmra.mrb[12].mxu0 %vm636_vm2, %v748_v49 }
 0x2b5   : > { %1702 = vmatprep.mubr.msk.bf16.mxu0 %vm1958_vm1, %v1957_v13  ;;  %1701 = vmatpush3.bf16.msra.mxu0 %v862_v22 }
 0x2b6   : > { %1712 = vmatprep.subr.bf16.mxu0 %v1957_v13 }
 0x314   : > { %v677_v55 = vpop.f32.mrb[8].mxu0 }
 0x315   : > { %v678_v56 = vadd.f32 %v677_v55, %v2158_v54  ;;  %v1680_v57 = vpop.f32.mrb[9].mxu0 }
 0x316   : > { %v680_v58 = vpop.f32.mrb[10].mxu0 }
 0x317   : > { %v1681_v59 = vpop.f32.mrb[11].mxu0  ;;  %v683_v60 = vsel %vm636_vm2, %v678_v56, -inf }
 0x318   : > { %684 = vmax.xlane.f32.xlu1 %v683_v60 }
 0x387   : > { %v791_v61 = vpop.f32.mrb[12].mxu0 }
 0x388   : > { %v792_v62 = vadd.f32 %v791_v61, %v2158_v54  ;;  %v1692_v63 = vpop.f32.mrb[13].mxu0 }
 0x389   : > { %v794_v1 = vpop.f32.mrb[14].mxu0 }
 0x38a   : > { %v1693_v2 = vpop.f32.mrb[15].mxu0  ;;  %v797_v3 = vsel %vm636_vm2, %v792_v62, -inf }
 0x38b   : > { %798 = vmax.xlane.f32.xlu0 %v797_v3 }
 0x3a5   : > { %v685_v4 = vpop.xlane.xlu1 %684 }
 0x3a6   : > { %v686_v5 = vsub.f32 %v678_v56, %v685_v4 }
 0x3a8   : > { %v687_v6 = vmul.f32 1.442695, %v686_v5 }
 0x3aa   : > { %1859 = vpow2.f32 %v687_v6 }
 0x3b4   : > { %v1860_v7 = vpop.eup %1859 }
 0x3b5   : > { %v689_v8 = vsel %vm636_vm2, %v1860_v7, 0.0 }
 0x3b6   : > { %690 = vadd.xlane.f32.xlu0 %v689_v8 }
 0x3cc   : > { %696 = vrot.lane.b32.xlu0 %v2143_v42, %s1961_s15  ;;  %s1964_s15 = smov 80  }
 0x418   : > { %v799_v9 = vpop.xlane.xlu0 %798 }
 0x419   : > { %v800_v10 = vsub.f32 %v792_v62, %v799_v9 }
 0x41b   : > { %v801_v11 = vmul.f32 1.442695, %v800_v10 }
 0x41d   : > { %1861 = vpow2.f32 %v801_v11 }
 0x427   : > { %v1862_v12 = vpop.eup %1861 }
 0x428   : > { %v803_v14 = vsel %vm636_vm2, %v1862_v12, 0.0 }
 0x429   : > { %804 = vadd.xlane.f32.xlu1 %v803_v14 }
 0x43a   : > { %809 = vrot.lane.b32.xlu1 %v2143_v42, %s1962_s17  ;;  %s1965_s17 = smov 104  }
 0x43e   : > { %952 = vrot.lane.b32.xlu1 %v2143_v42, %s1963_s19 }
 0x442   : > { %950 = vrot.lane.b32.xlu1 %v2140_v39, %s1963_s19 }
 0x443   : > { %v691_v15 = vpop.xlane.xlu0 %690 }
 0x444   : > { %1863 = vrcp.f32 %v691_v15 }
 0x447   : > { %v697_v16 = vpop.permute.xlu0 %696 }
 0x448   : > { %v703_v17 = vsel %vm701_vm4, %v697_v16, 0 }
 0x449   : > { %1683 = vmatpush3.bf16.msra.mxu1 %v703_v17 }
 0x44a   : > { %1694 = vmatprep.subr.bf16.mxu1 %v1957_v13 }
 0x44e   : > { %v1864_v18 = vpop.eup %1863 }
 0x44f   : > { %v693_v19 = vmul.f32 %v1864_v18, %v1860_v7 }
 0x451   : > { %v694_v20 = vpack.c.bf16 %v693_v19, %v693_v19 }
 0x453   : > { %1685 = vmatmul.mubr.msk.bf16.vlgmr.msra.gmra.mrb[0].mxu1 %vm636_vm2, %v694_v20 }
 0x454   : > { %1696 = vmatprep.mubr.msk.bf16.mxu1 %vm1958_vm1, %v1957_v13 }
 0x4b6   : > { %v805_v23 = vpop.xlane.xlu1 %804 }
 0x4b7   : > { %1865 = vrcp.f32 %v805_v23 }
 0x4ba   : > { %v810_v24 = vpop.permute.xlu1 %809 }
 0x4bb   : > { %v815_v25 = vsel %vm701_vm4, %v810_v24, 0 }
 0x4bc   : > { %1695 = vmatpush3.bf16.msra.mxu1 %v815_v25 }
 0x4bd   : > { %1706 = vmatprep.subr.bf16.mxu1 %v1957_v13 }
 0x4be   : > { %v953_v36 = vpop.permute.xlu1 %952 }
 0x4bf   : > { %v958_v43 = vsel %vm636_vm2, %v953_v36, 0 }
 0x4c1   : > { %v1866_v26 = vpop.eup %1865 }
 0x4c2   : > { %v807_v28 = vmul.f32 %v1866_v26, %v1862_v12  ;;  %v951_v45 = vpop.permute.xlu1 %950  ;;  %v632_v12 = vld [vmem:[%s2383_s3 + $0x8] sm:$0xf] }
 0x4c3   : > { %v1065_v14 = vsel %vm701_vm4, %v632_v12, 0 }
 0x4c4   : > { %v808_v29 = vpack.c.bf16 %v807_v28, %v807_v28 }
 0x4c6   : > { %1697 = vmatmul.mubr.msk.bf16.vlgmr.msra.gmra.mrb[4].mxu1 %vm636_vm2, %v808_v29 }
 0x4c7   : > { %1707 = vmatpush3.bf16.msra.mxu1 %v908_v30  ;;  %1708 = vmatprep.mubr.msk.bf16.mxu1 %vm1958_vm1, %v1957_v13 }
 0x4c8   : > { %1718 = vmatprep.subr.bf16.mxu1 %v1957_v13 }
 0x526   : > { %v739_v31 = vpop.f32.mrb[0].mxu1 }
 0x527   : > { %v745_v32 = vpack.c.bf16 %v739_v31, %v739_v31  ;;  %v1686_v33 = vpop.f32.mrb[1].mxu1 }
 0x528   : > { %v742_v34 = vpop.f32.mrb[2].mxu1 }
 0x529   : > { %v1687_v35 = vpop.f32.mrb[3].mxu1  ;;  %1709 = vmatmul.mubr.msk.bf16.vlgmr.msra.gmra.mrb[8].mxu1 %vm636_vm2, %v745_v32 }
 0x52a   : > { %1720 = vmatprep.mubr.msk.bf16.mxu1 %vm1958_vm1, %v1957_v13 }
 0x599   : > { %v851_v37 = vpop.f32.mrb[4].mxu1 }
 0x59a   : > { %v857_v38 = vpack.c.bf16 %v851_v37, %v851_v37  ;;  %v1698_v40 = vpop.f32.mrb[5].mxu1 }
 0x59b   : > { %v854_v41 = vpop.f32.mrb[6].mxu1 }
 0x59c   : > { %v1699_v44 = vpop.f32.mrb[7].mxu1  ;;  %1703 = vmatmul.mubr.msk.bf16.vlgmr.msra.gmra.mrb[16].mxu0 %vm636_vm2, %v857_v38 }
 0x59d   : > { %1713 = vmatpush3.bf16.xpose.msra.mxu0 %v958_v43  ;;  %1714 = vmatprep.mubr.msk.bf16.mxu0 %vm1958_vm1, %v1957_v13 }
 0x59e   : > { %1724 = vmatprep.subr.bf16.mxu0 %v1957_v13 }
 0x5a4   : > { %1715 = vmatmul.mubr.msk.bf16.vlgmr.msra.gmra.mrb[20].mxu0 %vm636_vm2, %v951_v45 }
 0x5a5   : > { %1726 = vmatprep.mubr.msk.bf16.mxu0 %vm1958_vm1, %v1957_v13  ;;  %1725 = vmatpush3.bf16.msra.mxu0 %v1065_v14  ;;  %v1600_v14 = vld [vmem:[%s2368_s8] ss:$0 sm:$0xff] }
 0x5a6   : > { %1736 = vmatprep.subr.bf16.mxu0 %v1957_v13 }
 0x5fc   : > { %v944_v46 = vpop.f32.mrb[8].mxu1 }
 0x5fd   : > { %v1710_v47 = vpop.f32.mrb[9].mxu1 }
 0x5fe   : > { %v947_v48 = vpop.f32.mrb[10].mxu1 }
 0x5ff   : > { %v1711_v49 = vpop.f32.mrb[11].mxu1 }
 0x66f   : > { %v898_v50 = vpop.f32.mrb[16].mxu0 }
 0x670   : > { %v2201_v51 = vadd.f32 %v944_v46, %v898_v50  ;;  %v1704_v52 = vpop.f32.mrb[17].mxu0 }
 0x671   : > { %v901_v53 = vpop.f32.mrb[18].mxu0  ;;  %v1598_v52 = vld [vmem:[%s2364_s4] ss:$0 sm:$0xff] }
 0x672   : > { %v1705_v55 = vpop.f32.mrb[19].mxu0 }
 0x677   : > { %v994_v56 = vpop.f32.mrb[20].mxu0 }
 0x678   : > { %v995_v57 = vadd.f32 %v994_v56, %v2158_v54  ;;  %v1716_v58 = vpop.f32.mrb[21].mxu0 }
 0x679   : > { %v997_v59 = vpop.f32.mrb[22].mxu0 }
 0x67a   : > { %v1717_v60 = vpop.f32.mrb[23].mxu0  ;;  %v1000_v61 = vsel %vm636_vm2, %v995_v57, -inf }
 0x67b   : > { %1001 = vmax.xlane.f32.xlu0 %v1000_v61 }
 0x691   : > { %1012 = vrot.lane.b32.xlu0 %v2143_v42, %s1964_s15  ;;  %s1615_s15 = sshll.u32 %s1947_s28, 7 }
 0x692   : > { %s2312_s2 = scalar_lea.hbm %s2373_s13, %s1615_s15 }
 0x695   : > { %1108 = vrot.lane.b32.xlu0 %v2140_v39, %s1965_s17 }
 0x708   : > { %v1002_v62 = vpop.xlane.xlu0 %1001 }
 0x709   : > { %v1003_v63 = vsub.f32 %v995_v57, %v1002_v62 }
 0x70b   : > { %v1004_v1 = vmul.f32 1.442695, %v1003_v63 }
 0x70c   : > { %v1013_v2 = vpop.permute.xlu0 %1012 }
 0x70d   : > { %1867 = vpow2.f32 %v1004_v1  ;;  %v1018_v3 = vsel %vm701_vm4, %v1013_v2, 0  ;;  %v1845_v1 = vld [vmem:[%s2369_s9] sm:$0xff]  }
 0x70e   : > { %1719 = vmatpush3.bf16.msra.mxu1 %v1018_v3  ;;  %v1847_v2 = vld [vmem:[%s2371_s11] sm:$0xff]   ;;  %v1848_v3 = vld [vmem:[%s2371_s11 + $0x8] sm:$0xff]  }
 0x70f   : > { %1730 = vmatprep.subr.bf16.mxu1 %v1957_v13 }
 0x710   : > { %v1109_v11 = vpop.permute.xlu0 %1108 }
 0x717   : > { %v1868_v4 = vpop.eup %1867 }
 0x718   : > { %v1006_v5 = vsel %vm636_vm2, %v1868_v4, 0.0 }
 0x719   : > { %1007 = vadd.xlane.f32.xlu1 %v1006_v5  ;;  %v1850_v5 = vld [vmem:[%s2371_s11 + $0x18] sm:$0xff]  }
 0x72a   : > { %1110 = vrot.lane.b32.xlu1 %v2143_v42, %s1965_s17 }
 0x7a6   : > { %v1008_v6 = vpop.xlane.xlu1 %1007 }
 0x7a7   : > { %1869 = vrcp.f32 %v1008_v6  ;;  %v1851_v6 = vld [vmem:[%s2371_s11 + $0x20] sm:$0xff]  }
 0x7aa   : > { %v1111_v8 = vpop.permute.xlu1 %1110 }
 0x7ab   : > { %v1116_v10 = vsel %vm636_vm2, %v1111_v8, 0 }
 0x7b1   : > { %v1870_v7 = vpop.eup %1869 }
 0x7b2   : > { %v1010_v39 = vmul.f32 %v1870_v7, %v1868_v4  ;;  %v1849_v4 = vld [vmem:[%s2371_s11 + $0x10] sm:$0xff]   ;;  %v1852_v7 = vld [vmem:[%s2371_s11 + $0x28] sm:$0xff]  }
 0x7b4   : > { %v1011_v9 = vpack.c.bf16 %v1010_v39, %v1010_v39 }
 0x7b6   : > { %1721 = vmatmul.mubr.msk.bf16.vlgmr.msra.gmra.mrb[12].mxu1 %vm636_vm2, %v1011_v9 }
 0x7b7   : > { %1731 = vmatpush3.bf16.xpose.msra.mxu1 %v1116_v10  ;;  %1732 = vmatprep.mubr.msk.bf16.mxu1 %vm1958_vm1, %v1957_v13 }
 0x7b8   : > { %1742 = vmatprep.subr.bf16.mxu1 %v1957_v13 }
 0x7be   : > { %1733 = vmatmul.mubr.msk.bf16.vlgmr.msra.gmra.mrb[16].mxu1 %vm636_vm2, %v1109_v11  ;;  %v1599_v11 = vld [vmem:[%s2367_s7] ss:$0 sm:$0xff] }
 0x7bf   : > { %1744 = vmatprep.mubr.msk.bf16.mxu1 %vm1958_vm1, %v1957_v13 }
 0x889   : > { %v1054_v15 = vpop.f32.mrb[12].mxu1 }
 0x88a   : > { %v1060_v16 = vpack.c.bf16 %v1054_v15, %v1054_v15  ;;  %v1722_v17 = vpop.f32.mrb[13].mxu1 }
 0x88b   : > { %v1057_v18 = vpop.f32.mrb[14].mxu1 }
 0x88c   : > { %v1723_v19 = vpop.f32.mrb[15].mxu1  ;;  %1727 = vmatmul.mubr.msk.bf16.vlgmr.msra.gmra.mrb[24].mxu0 %vm636_vm2, %v1060_v16  ;;  %v1853_v18 = vld [vmem:[%s2371_s11 + $0x30] sm:$0xff]  }
 0x88d   : > { %1738 = vmatprep.mubr.msk.bf16.mxu0 %vm1958_vm1, %v1957_v13  ;;  %v1854_v19 = vld [vmem:[%s2371_s11 + $0x38] sm:$0xff]  }
 0x891   : > { %v1152_v20 = vpop.f32.mrb[16].mxu1 }
 0x892   : > { %v1153_v21 = vadd.f32 %v1152_v20, %v2158_v54  ;;  %v1734_v22 = vpop.f32.mrb[17].mxu1  ;;  %v633_v54 = vld [vmem:[%s2383_s3 + $0xc] sm:$0xf]  ;;  %v1601_v20 = vld [vmem:[%s2370_s10] ss:$0 sm:$0xff]  ;;  %s1883_s3 = scalar_lea.vmem %s1882_s0, 256 }
 0x893   : > { %v1155_v23 = vpop.f32.mrb[18].mxu1  ;;  %v1223_v31 = vsel %vm701_vm4, %v633_v54, 0 }
 0x894   : > { %v1735_v24 = vpop.f32.mrb[19].mxu1  ;;  %v1158_v25 = vsel %vm636_vm2, %v1153_v21, -inf  ;;  %1743 = vmatpush3.bf16.msra.mxu1 %v1223_v31 }
 0x895   : > { %1159 = vmax.xlane.f32.xlu1 %v1158_v25  ;;  %1756 = vmatprep.subr.bf16.mxu1 %v1957_v13 }
 0x922   : > { %v1160_v26 = vpop.xlane.xlu1 %1159 }
 0x923   : > { %v1161_v27 = vsub.f32 %v1153_v21, %v1160_v26 }
 0x925   : > { %v1162_v28 = vmul.f32 1.442695, %v1161_v27 }
 0x927   : > { %1871 = vpow2.f32 %v1162_v28 }
 0x931   : > { %v1872_v29 = vpop.eup %1871 }
 0x932   : > { %v1164_v30 = vsel %vm636_vm2, %v1872_v29, 0.0 }
 0x933   : > { %1165 = vadd.xlane.f32.xlu0 %v1164_v30 }
 0x949   : > { %1170 = vrot.lane.b32.xlu0 %v2143_v42, %s1966_s23  ;;  %s443_s23 = sand.u32 1, %s1939_s26  }
 0x94a   : > { %s1576_s24 = sshll.u32 %s443_s23, 3  ;;  %s1487_s28 = scalar_lea.sflag [#allocation3], %s443_s23 }
 0x94b   : > { %s445_s17 = scalar_lea.vmem [#allocation2], %s1576_s24 }
 0x94c   : > { %s1501_s19 = sshll.u32 %s445_s17, 4  ;;  %s2314_s19 = int_to_ptr.vmem [resolvable:$true] %s1501_s19 }
 0x94d   : > { %s1877_s24 = scalar_lea.vmem %s2314_s19, 128  ;;  %p1884_p1 = scmp.lt.s32.totalorder %s2314_s19, %s1882_s0 }
 0x94e   : > { %p1878_p12 = scmp.ne.s32.totalorder %s2314_s19, %s1877_s24  ;;  %p1885_p2 = scmp.lt.s32.totalorder %s1883_s3, %s1877_s24 }
 0x950   : > { %p1879_p13 = pnand %p1878_p12, %p2078_p4  ;;  %p1886_p3 = por %p1885_p2, %p1884_p1 }
 0x952   : > { %p1880_p0 = pneg %p1879_p13 }
 0x954   : > { %p1887_p5 = pnand %p1886_p3, %p1880_p0 }
 0x95f   : > { %v1101_v32 = vpop.f32.mrb[24].mxu0 }
 0x960   : > { %v1107_v33 = vadd.f32 %v1101_v32, %v2201_v51  ;;  %v1728_v34 = vpop.f32.mrb[25].mxu0 }
 0x961   : > { %v1104_v35 = vpop.f32.mrb[26].mxu0 }
 0x962   : > { %v1729_v36 = vpop.f32.mrb[27].mxu0 }
 0x9c0   : > { %v1166_v37 = vpop.xlane.xlu0 %1165 }
 0x9c1   : > { %1873 = vrcp.f32 %v1166_v37 }
 0x9c4   : > { %v1171_v38 = vpop.permute.xlu0 %1170 }
 0x9c5   : > { %v1176_v42 = vsel %vm701_vm4, %v1171_v38, 0 }
 0x9c6   : > { %1737 = vmatpush3.bf16.msra.mxu0 %v1176_v42 }
 0x9c7   : > { %1748 = vmatprep.subr.bf16.mxu0 %v1957_v13 }
 0x9cb   : > { %v1874_v40 = vpop.eup %1873 }
 0x9cc   : > { %v1168_v41 = vmul.f32 %v1874_v40, %v1872_v29 }
 0x9ce   : > { %v1169_v43 = vpack.c.bf16 %v1168_v41, %v1168_v41 }
 0x9d0   : > { %1739 = vmatmul.mubr.msk.bf16.vlgmr.msra.gmra.mrb[28].mxu0 %vm636_vm2, %v1169_v43 }
 0x9d1   : > { %1752 = vmatprep.mubr.msk.bf16.mxu0 %vm1958_vm1, %v1957_v13  ;;  %1749 = vmatpush3.bf16.msra.mxu0 %v1845_v1 }
 0x9d2   : > { %1750 = vmatprep.subr.bf16.mxu0 %v1957_v13 }
 0xaa3   : > { %v1212_v44 = vpop.f32.mrb[28].mxu0 }
 0xaa4   : > { %v1218_v45 = vpack.c.bf16 %v1212_v44, %v1212_v44  ;;  %v1740_v46 = vpop.f32.mrb[29].mxu0 }
 0xaa5   : > { %v1215_v47 = vpop.f32.mrb[30].mxu0 }
 0xaa6   : > { %v1741_v48 = vpop.f32.mrb[31].mxu0  ;;  %1745 = vmatmul.mubr.msk.bf16.vlgmr.msra.gmra.mrb[20].mxu1 %vm636_vm2, %v1218_v45 }
 0xaa7   : > { %1772 = vmatprep.mubr.msk.bf16.mxu1 %vm1958_vm1, %v1957_v13  ;;  %1757 = vmatpush3.bf16.msra.mxu1 %v1847_v2 }
 0xaa8   : > { %1758 = vmatprep.subr.bf16.mxu1 %v1957_v13 }
 0xaab   : > { %1759 = vmatpush3.bf16.msra.mxu1 %v1848_v3 }
 0xaac   : > { %1760 = vmatprep.subr.bf16.mxu1 %v1957_v13 }
 0xaaf   : > { %1761 = vmatpush3.bf16.msra.mxu1 %v1849_v4 }
 0xab0   : > { %1762 = vmatprep.subr.bf16.mxu1 %v1957_v13 }
 0xab3   : > { %1763 = vmatpush3.bf16.msra.mxu1 %v1850_v5 }
 0xab4   : > { %1764 = vmatprep.subr.bf16.mxu1 %v1957_v13 }
 0xab7   : > { %1765 = vmatpush3.bf16.msra.mxu1 %v1851_v6 }
 0xab8   : > { %1766 = vmatprep.subr.bf16.mxu1 %v1957_v13 }
 0xabb   : > { %1767 = vmatpush3.bf16.msra.mxu1 %v1852_v7 }
 0xabc   : > { %1768 = vmatprep.subr.bf16.mxu1 %v1957_v13 }
 0xabf   : > { %1769 = vmatpush3.bf16.msra.mxu1 %v1853_v18 }
 0xac0   : > { %1770 = vmatprep.subr.bf16.mxu1 %v1957_v13  ;;  %v1605_v13 = vld [vmem:[%s2372_s12] ss:$0 sm:$0xff] }
 0xac3   : > { %1771 = vmatpush3.bf16.msra.mxu1 %v1854_v19 }
 0xb79   : > { %v1259_v49 = vpop.f32.mrb[20].mxu1 }
 0xb7a   : > { %v1265_v50 = vadd.f32 %v1259_v49, %v1107_v33  ;;  %v1746_v51 = vpop.f32.mrb[21].mxu1 }
 0xb7b   : > { %v1262_v53 = vpop.f32.mrb[22].mxu1 }
 0xb7c   : > { %v1266_v55 = vadd.f32 %v1265_v50, %v2098_v0  ;;  %v1747_v56 = vpop.f32.mrb[23].mxu1  ;;  %v1846_v0 = vld [vmem:[%s2369_s9 + $0x8] sm:$0xff]  }
 0xb7d   : > { %1751 = vmatpush3.bf16.msra.mxu0 %v1846_v0 }
 0xb7e   : > { %v2249_v57 = vadd.f32 %v1598_v52, %v1266_v55 }
 0xb80   : > { %v1277_v58 = vsel %vm457_vm0, %v2249_v57, 0.0 }
 0xb81   : > { %1278 = vadd.xlane.f32.xlu1 %v1277_v58 }
 0xc0e   : > { %v1279_v59 = vpop.xlane.xlu1 %1278 }
 0xc0f   : > { %v1280_v60 = vmul.f32 0.03125, %v1279_v59 }
 0xc11   : > { %v1281_v61 = vsub.f32 %v2249_v57, %v1280_v60 }
 0xc13   : > { %v1282_v62 = vmul.f32 %v1281_v61, %v1281_v61 }
 0xc15   : > { %v1283_v63 = vsel %vm457_vm0, %v1282_v62, 0.0 }
 0xc16   : > { %1284 = vadd.xlane.f32.xlu1 %v1283_v63 }
 0xca3   : > { %v1285_v39 = vpop.xlane.xlu1 %1284 }
 0xca4   : > { %v1286_v8 = vmul.f32 0.03125, %v1285_v39 }
 0xca6   : > { %v1287_v9 = vadd.f32 1e-05, %v1286_v8 }
 0xca8   : > { %1875 = vrsqrt.f32 %v1287_v9 }
 0xcb2   : > { %v1876_v10 = vpop.eup %1875 }
 0xcb3   : > { %v1289_v12 = vmul.f32 %v1876_v10, %v1281_v61 }
 0xcb5   : > { %v1296_v15 = vmul.f32 %v1599_v11, %v1289_v12 }
 0xcb7   : > { %v1303_v16 = vadd.f32 %v1600_v14, %v1296_v15 }
 0xcb9   : > { %v1304_v17 = vpack.c.bf16 %v1303_v16, %v1303_v16 }
 0xcbb   : > { %1753 = vmatmul.mubr.msk.bf16.vlgmr.msra.gmra.mrb[32].mxu0 %vm457_vm0, %v1304_v17 }
 0xd8e   : > { %v1365_v21 = vpop.f32.mrb[32].mxu0 }
 0xd8f   : > { %v1366_v22 = vadd.f32 %v1601_v20, %v1365_v21  ;;  %v1754_v23 = vpop.f32.mrb[33].mxu0 }
 0xd90   : > { %v1368_v24 = vpop.f32.mrb[34].mxu0 }
 0xd91   : > { %v1371_v25 = vmax.f32 %v1366_v22, 0.0  ;;  %v1755_v26 = vpop.f32.mrb[35].mxu0 }
 0xd93   : > { %v1372_v27 = vpack.c.bf16 %v1371_v25, %v1371_v25 }
 0xd95   : > { %1773 = vmatmul.mubr.bf16.vlgmr.msra.gmra.mrb[24].mxu1 %v1372_v27 }
 0xe68   : > { %v1478_v28 = vpop.f32.mrb[24].mxu1 }
 0xe69   : > { %v1479_v29 = vadd.f32 %v1605_v13, %v1478_v28  ;;  %v1774_v30 = vpop.f32.mrb[25].mxu1 }
 0xe6a   : > { %v1481_v54 = vpop.f32.mrb[26].mxu1 }
 0xe6b   : > { %v1484_v31 = vadd.f32 %v1479_v29, %v2249_v57  ;;  %v1775_v32 = vpop.f32.mrb[27].mxu1 }
 0xe6d   : > { %1485 = vst.msk [vmem:[%s445_s17] sm:$0xff] %vm457_vm0, %v1484_v31 }
 0xe6e   : > { %1890 = shalt.err (!%p1887_p5)
}
 0xe6f   : > { %s1891_s1 = scalar_lea.hbm %s2312_s2, 128  ;;  %s1895_s17 = scalar_lea.hbm %s2373_s13, 256 }
 0xe70   : > { %p1892_p6 = scmp.ne.s32.totalorder %s2312_s2, %s1891_s1  ;;  %p1896_p10 = scmp.lt.u32.totalorder %s2312_s2, %s2373_s13 }
 0xe71   : > { %p1897_p11 = scmp.lt.u32.totalorder %s1895_s17, %s1891_s1  ;;  %p1899_p13 = scmp.lt.u32.totalorder %s1891_s1, %s2312_s2 }
 0xe72   : > { %p1893_p7 = pnand %p1892_p6, %p2078_p4 }
 0xe73   : > { %p1898_p12 = por %p1897_p11, %p1896_p10 }
 0xe74   : > { %p1894_p9 = pneg %p1893_p7 }
 0xe75   : > { %p1900_p0 = por %p1899_p13, %p1898_p12 }
 0xe77   : > { %p1901_p1 = pnand %p1900_p0, %p1894_p9 }
 0xe79   : > { %1904 = shalt.err (!%p1901_p1)
}
 0xe7a   : > { %1776 = dma.vmem_to_hbm [thread:$0]  (%p2078_p4), %s2314_s19, 128, %s2312_s2, %s1487_s28  }
 0xe7b PF: > { %p1782_p2 = scmp.ge.s32.totalorder %s1955_s30, 2  ;;  %s1513_s3 = sand.u32 1, %s1935_s25  }
 0xe7c   : > { %s1514_s24 = scalar_lea.sflag [#allocation3], %s1513_s3 }
 0xe7d   : > { %p1779_p3 = pnand %p1782_p2, %p2085_p8 }
 0xe7f   : > { %1930 = dma.done.wait (!%p1779_p3), %s1514_s24, 128  }
 0xe80   : > { %1932 = vsyncadd (!%p1779_p3), %s1514_s24, 4294967168  ;;  %s26_s30 = sadd.s32 1, %s1955_s30   ;;  %s2384_s25 = smov %s1939_s26 }
 0xe81   : > { %p23_p5 = scmp.ge.s32.totalorder %s26_s30, 4   ;;  %s2385_s26 = smov %s1943_s27 }
 0xe82   : > { %s2386_s27 = smov %s2091_s21  ;;  %s2387_s28 = smov %s1951_s29 }
 0xe83   : > { %s2388_s29 = smov %s2390_s16  ;;  %25 = sbr.rel (!%p23_p5) target bundleno = 9 (0x9), region = 108 }
 0xe8a   :  { %1519 = vsyncpa [#allocation3], 1 }
 0xe8b   :  { %1521 = vsyncpa [#allocation3 + $0x1], 1 }

</bundles_post_ra>
